<compile_context>
chip_gen: v7x
topology: tpu7x:2x2x1
jax: 0.10.0
libtpu: 0.0.40
codegen_flags: <defaults>
</compile_context>

<pallas_src>
import jax
import jax.numpy as jnp
from jax.experimental import pallas as pl
from jax.experimental.pallas import tpu as pltpu

# Quantization params of the synthetic quantized input.
IN_SCALE = 0.05
IN_ZERO_POINT = 0
# Output quantization params (from the module).
OUT_SCALE = 0.0036
OUT_ZERO_POINT = 0

_LANES = 128
_MAX_TILE = 2048  # packed rows per grid step (256 KiB int8 in + 256 KiB out)


def _round_up(a, b):
    return ((a + b - 1) // b) * b


def _cdiv(a, b):
    return -(-a // b)


def _pick_tile(n_rows):
    """First-dim block size: big enough to amortize the ~0.35us per-step
    pipeline overhead, small enough for v7x's 64 MiB VMEM, multiple of 32
    (int8 sublane packing), and >=2 grid steps when there is enough work so
    the 'parallel' axis can shard across v7x's two TensorCores."""
    if n_rows > 64:
        return min(_MAX_TILE, _round_up(_cdiv(n_rows, 2), 32))
    return _round_up(n_rows, 8)


def _softmax_q_packed_kernel(x_ref, seg_ref, o_ref):
    # x_ref: (tile, 128) int8 -- each 128-lane row holds 128//W independent
    #        softmax groups of width W packed back-to-back.
    # seg_ref: (128, 128) f32 block-diagonal ones (segment-membership matrix).
    # o_ref: (tile, 128) int8.
    xq = x_ref[...].astype(jnp.int32)
    # Dequantization is a monotone affine map, so max commutes with it and the
    # zero point cancels after subtraction. A per-row max (over all packed
    # groups) is a valid stabilizer for every group in the row because the int8
    # range bounds |x - max| by 255*IN_SCALE (no f32 over/underflow).
    m = jnp.max(xq, axis=-1, keepdims=True)
    e = jnp.exp((xq - m).astype(jnp.float32) * jnp.float32(IN_SCALE))
    # Segmented (per-group) sum, broadcast back to every lane of its group, via
    # a single MXU matmul with a 0/1 block-diagonal matrix.
    denom = jnp.dot(e, seg_ref[...], preferred_element_type=jnp.float32)
    inv = pl.reciprocal(denom, approx=True)  # EUP slot, ~free vs. the VALU
    q = jnp.round(e * (inv * jnp.float32(1.0 / OUT_SCALE))) + jnp.float32(OUT_ZERO_POINT)
    o_ref[...] = jnp.clip(q, -128.0, 127.0).astype(jnp.int8)


def _softmax_q_rowwise_kernel(x_ref, o_ref):
    # Fallback for W that does not divide 128: softmax over the full last axis.
    xq = x_ref[...].astype(jnp.int32)
    m = jnp.max(xq, axis=-1, keepdims=True)
    e = jnp.exp((xq - m).astype(jnp.float32) * jnp.float32(IN_SCALE))
    s = jnp.sum(e, axis=-1, keepdims=True)
    inv = pl.reciprocal(s, approx=True)
    q = jnp.round(e * (inv * jnp.float32(1.0 / OUT_SCALE))) + jnp.float32(OUT_ZERO_POINT)
    o_ref[...] = jnp.clip(q, -128.0, 127.0).astype(jnp.int8)


def softmax_quant(x_q):
    """x_q: int8 (N, C, H, W) payload of a per-tensor-quantized tensor with
    scale=IN_SCALE, zero_point=IN_ZERO_POINT. Returns the int8 payload of
    quantize_per_tensor(softmax(dequantize(x_q), dim=3), 0.0036, 0, qint8)."""
    N, C, H, W = x_q.shape
    rows = N * C * H
    x2 = x_q.reshape(rows, W)

    compiler_params = pltpu.CompilerParams(
        dimension_semantics=("parallel",),
        vmem_limit_bytes=32 * 1024 * 1024,
    )

    if W <= _LANES and _LANES % W == 0:
        # Lane-dense path: pack 128//W softmax groups per 128-lane row.
        groups = _LANES // W
        packed = _cdiv(rows, groups)
        tile = _pick_tile(packed)
        grid = _cdiv(packed, tile)
        padded_packed = grid * tile
        padded_rows = padded_packed * groups
        if padded_rows != rows:
            x2 = jnp.pad(x2, ((0, padded_rows - rows), (0, 0)))
        xp = x2.reshape(padded_packed, _LANES)

        # Block-diagonal segment-membership matrix (groups of W lanes).
        lane_group = jnp.arange(_LANES, dtype=jnp.int32) // W
        seg = (lane_group[:, None] == lane_group[None, :]).astype(jnp.float32)

        out_p = pl.pallas_call(
            _softmax_q_packed_kernel,
            out_shape=jax.ShapeDtypeStruct((padded_packed, _LANES), jnp.int8),
            grid_spec=pltpu.PrefetchScalarGridSpec(
                num_scalar_prefetch=0,
                grid=(grid,),
                in_specs=[
                    pl.BlockSpec((tile, _LANES), lambda i: (i, 0)),
                    pl.BlockSpec((_LANES, _LANES), lambda i: (0, 0)),
                ],
                out_specs=pl.BlockSpec((tile, _LANES), lambda i: (i, 0)),
            ),
            compiler_params=compiler_params,
        )(xp, seg)

        out2 = out_p.reshape(padded_rows, W)[:rows]
    else:
        # General-W fallback (W already lane-dense or awkward): row-wise softmax.
        tile = _pick_tile(rows)
        grid = _cdiv(rows, tile)
        padded_rows = grid * tile
        if padded_rows != rows:
            x2 = jnp.pad(x2, ((0, padded_rows - rows), (0, 0)))
        out2 = pl.pallas_call(
            _softmax_q_rowwise_kernel,
            out_shape=jax.ShapeDtypeStruct((padded_rows, W), jnp.int8),
            grid_spec=pltpu.PrefetchScalarGridSpec(
                num_scalar_prefetch=0,
                grid=(grid,),
                in_specs=[pl.BlockSpec((tile, W), lambda i: (i, 0))],
                out_specs=pl.BlockSpec((tile, W), lambda i: (i, 0)),
            ),
            compiler_params=compiler_params,
        )(x2)[:rows]

    return out2.reshape(N, C, H, W)


if __name__ == "__main__":
    # Small NCHW input consistent with the module's forward (softmax over dim=3).
    N, C, H, W = 2, 4, 16, 16
    key = jax.random.PRNGKey(0)
    # Synthetic quantized input: int8 payload (zero_point=0, scale=IN_SCALE).
    x_q = jax.random.randint(key, (N, C, H, W), minval=-128, maxval=128,
                             dtype=jnp.int32).astype(jnp.int8)

    out = softmax_quant(x_q)
    jax.block_until_ready(out)

    # Pure-JAX reference of the module's forward (int8 payload of the output).
    x_f = (x_q.astype(jnp.float32) - IN_ZERO_POINT) * IN_SCALE
    ref = jax.nn.softmax(x_f, axis=3)
    ref_q = jnp.clip(jnp.round(ref / OUT_SCALE) + OUT_ZERO_POINT, -128, 127).astype(jnp.int8)

    assert out.shape == (N, C, H, W) and out.dtype == jnp.int8
    assert int(jnp.max(jnp.abs(out.astype(jnp.int32) - ref_q.astype(jnp.int32)))) <= 1

    print("KERNEL_OK")
</pallas_src>

<mosaic_0001>
module attributes {stable_mosaic.version = 11 : i64} {
  func.func @_softmax_q_packed_kernel(%arg0: i32, %arg1: memref<16x128xi8, #tpu.memory_space<vmem>>, %arg2: memref<128x128xf32, #tpu.memory_space<vmem>>, %arg3: memref<16x128xi8, #tpu.memory_space<vmem>>) attributes {dimension_semantics = [#tpu.dimension_semantics<parallel>], iteration_bounds = array<i64: 1>, scalar_prefetch = 0 : i64, scratch_operands = 0 : i64, tpu.core_type = #tpu.core_type<tc>, window_params = [{transform_indices = @transform_0, window_bounds = array<i64: 16, 128>}, {pipeline_mode = #tpu.pipeline_mode<synchronous>, transform_indices = @transform_1, window_bounds = array<i64: 128, 128>}, {transform_indices = @transform_2, window_bounds = array<i64: 16, 128>}]} {
    %c0 = arith.constant 0 : index
    %c0_0 = arith.constant 0 : index
    %0 = vector.load %arg1[%c0, %c0_0] : memref<16x128xi8, #tpu.memory_space<vmem>>, vector<16x128xi8>
    %1 = arith.extsi %0 : vector<16x128xi8> to vector<16x128xi32>
    %cst = arith.constant dense<-2147483648> : vector<16xi32>
    %2 = vector.multi_reduction <maxsi>, %1, %cst [1] : vector<16x128xi32> to vector<16xi32>
    %3 = vector.shape_cast %2 : vector<16xi32> to vector<16x1xi32>
    %4 = vector.broadcast %3 : vector<16x1xi32> to vector<16x128xi32>
    %5 = arith.subi %1, %4 : vector<16x128xi32>
    %6 = arith.sitofp %5 : vector<16x128xi32> to vector<16x128xf32>
    %cst_1 = arith.constant 5.000000e-02 : f32
    %7 = vector.broadcast %cst_1 : f32 to vector<16x128xf32>
    %8 = arith.mulf %6, %7 : vector<16x128xf32>
    %9 = math.exp %8 : vector<16x128xf32>
    %c0_2 = arith.constant 0 : index
    %c0_3 = arith.constant 0 : index
    %10 = vector.load %arg2[%c0_2, %c0_3] : memref<128x128xf32, #tpu.memory_space<vmem>>, vector<128x128xf32>
    %cst_4 = arith.constant dense<0.000000e+00> : vector<16x128xf32>
    %11 = tpu.matmul %9, %10, %cst_4 {dimension_numbers = #tpu.dot_dimension_numbers<[1], [0], [0], [1], [0, 0, 1, 1], [], []>} : vector<16x128xf32>, vector<128x128xf32>, vector<16x128xf32> -> vector<16x128xf32>
    %12 = tpu.reciprocal %11 {approx = true} : vector<16x128xf32> -> vector<16x128xf32>
    %cst_5 = arith.constant 277.777771 : f32
    %13 = vector.broadcast %cst_5 : f32 to vector<16x128xf32>
    %14 = arith.mulf %12, %13 : vector<16x128xf32>
    %15 = arith.mulf %9, %14 : vector<16x128xf32>
    %16 = math.roundeven %15 : vector<16x128xf32>
    %cst_6 = arith.constant 0.000000e+00 : f32
    %17 = vector.broadcast %cst_6 : f32 to vector<16x128xf32>
    %18 = arith.addf %16, %17 : vector<16x128xf32>
    %cst_7 = arith.constant -1.280000e+02 : f32
    %cst_8 = arith.constant 1.270000e+02 : f32
    %19 = vector.broadcast %cst_7 : f32 to vector<16x128xf32>
    %20 = arith.maximumf %19, %18 : vector<16x128xf32>
    %21 = vector.broadcast %cst_8 : f32 to vector<16x128xf32>
    %22 = arith.minimumf %21, %20 : vector<16x128xf32>
    %23 = arith.fptosi %22 : vector<16x128xf32> to vector<16x128xi8>
    %c0_9 = arith.constant 0 : index
    %c0_10 = arith.constant 0 : index
    %24 = vector.load %arg3[%c0_9, %c0_10] : memref<16x128xi8, #tpu.memory_space<vmem>>, vector<16x128xi8>
    tpu.vector_store %arg3[%c0_9, %c0_10], %23 {strides = array<i32>} : memref<16x128xi8, #tpu.memory_space<vmem>>, vector<16x128xi8>,
    return
  }
  func.func @transform_0(%arg0: i32) -> (i32, i32) {
    %c0_i32 = arith.constant 0 : i32
    %c0_i32_0 = arith.constant 0 : i32
    return %arg0, %c0_i32 : i32, i32
  }
  func.func @transform_1(%arg0: i32) -> (i32, i32) {
    %c0_i32 = arith.constant 0 : i32
    %c0_i32_0 = arith.constant 0 : i32
    %c0_i32_1 = arith.constant 0 : i32
    return %c0_i32, %c0_i32_0 : i32, i32
  }
  func.func @transform_2(%arg0: i32) -> (i32, i32) {
    %c0_i32 = arith.constant 0 : i32
    %c0_i32_0 = arith.constant 0 : i32
    return %arg0, %c0_i32 : i32, i32
  }
}

</mosaic_0001>

<bundles_post_ra>
// kernel: tpu_custom_call.1
= control target key start
LH: loop header
LB: loop body
LE: loop exit
PB: predicated region body
PF: predicated region fallthrough
CT: control target
= control target key end

     0   :  { %7 = vsyncpa [#allocation3], 0  ;;  %s473_s0 = inlined_call_operand.hbm [shape: s8[16,128], index: 0, kind: input, shape index: {}]   ;;  %s474_s1 = inlined_call_operand.hbm [shape: f32[128,128], index: 1, kind: input, shape index: {}]   ;;  %s475_s2 = inlined_call_operand.hbm [shape: s8[16,128], index: 2, kind: output, shape index: {}]  }
   0x1   :  { %8 = vsyncpa [#allocation6], 0 }
   0x2   :  { %9 = vsyncpa [#allocation4], 0  ;;  %s399_s9 = smov [#allocation2]   ;;  %s327_s13 = scalar_lea.hbm %s473_s0, 64 }
   0x3   :  { %s15_s10 = sshll.u32 %s399_s9, 4  ;;  %p328_p0 = scmp.ne.s32.totalorder %s473_s0, %s327_s13  ;;  %s16_s10 = int_to_ptr.vmem [resolvable:$true] %s15_s10 }
   0x4   :  { %p331_p1 = scmp.lt.u32.totalorder %s327_s13, %s473_s0 }
   0x6   :  { %p333_p2 = pnand %p331_p1, %p328_p0 }
   0x8   :  { %336 = shalt.err (!%p333_p2)
}
   0x9   :  { %s337_s18 = scalar_lea.vmem %s16_s10, 64  ;;  %p342_p4 = scmp.lt.s32.totalorder %s16_s10, %s16_s10 }
   0xa   :  { %p338_p3 = scmp.ne.s32.totalorder %s16_s10, %s337_s18  ;;  %p343_p5 = scmp.lt.s32.totalorder %s337_s18, %s337_s18 }
   0xc   :  { %p344_p6 = por %p343_p5, %p342_p4 }
   0xe   :  { %p345_p7 = pnand %p344_p6, %p338_p3 }
  0x10   :  { %348 = shalt.err (!%p345_p7)
}
  0x11   :  { %s400_s19 = smov 32   ;;  %s401_s20 = smov 2  }
  0x12   :  { %21 = dma.hbm_to_vmem [thread:$0]  %s473_s0, 64, %s16_s10, [#allocation3], %s400_s19, %s400_s19, %s401_s20  }
  0x13   :  { %s402_s23 = smov [#allocation5]   ;;  %s349_s27 = scalar_lea.hbm %s474_s1, 2048 }
  0x14   :  { %s27_s24 = sshll.u32 %s402_s23, 4  ;;  %p350_p8 = scmp.ne.s32.totalorder %s474_s1, %s349_s27  ;;  %s28_s24 = int_to_ptr.vmem [resolvable:$true] %s27_s24 }
  0x15   :  { %p353_p9 = scmp.lt.u32.totalorder %s349_s27, %s474_s1 }
  0x17   :  { %p355_p10 = pnand %p353_p9, %p350_p8 }
  0x19   :  { %358 = shalt.err (!%p355_p10)
}
  0x1a   :  { %s359_s4 = scalar_lea.vmem %s28_s24, 2048  ;;  %p364_p12 = scmp.lt.s32.totalorder %s28_s24, %s28_s24 }
  0x1b   :  { %p360_p11 = scmp.ne.s32.totalorder %s28_s24, %s359_s4  ;;  %p365_p13 = scmp.lt.s32.totalorder %s359_s4, %s359_s4 }
  0x1d   :  { %p366_p0 = por %p365_p13, %p364_p12 }
  0x1f   :  { %p367_p1 = pnand %p366_p0, %p360_p11 }
  0x21   :  { %370 = shalt.err (!%p367_p1)
}
  0x22   :  { %s403_s0 = smov 128   ;;  %s404_s5 = smov 8  }
  0x23   :  { %33 = dma.hbm_to_vmem [thread:$0]  %s474_s1, 2048, %s28_s24, [#allocation6], %s403_s0, %s403_s0, %s404_s5  }
  0x24   :  { %393 = dma.done.wait [#allocation3], 64  }
  0x25   :  { %394 = vsyncadd [#allocation3], 4294967232 }
  0x26   :  { %395 = dma.done.wait [#allocation6], 2048  }
  0x27   :  { %396 = vsyncadd [#allocation6], 4294965248  ;;  %v222_v0 = vld [vmem:[#allocation2] sm:$0xf]   ;;  %v82_v7 = vld [vmem:[#allocation5] sm:$0xff]  ;;  %s405_s1 = smov [#allocation7]  }
  0x28   :  { %v448_v1 = vunpack.c.0.s8 %v222_v0  ;;  %v450_v2 = vunpack.c.1.s8 %v222_v0  ;;  %v83_v8 = vld [vmem:[#allocation5 + $0x8] sm:$0xff]  ;;  %v84_v9 = vld [vmem:[#allocation5 + $0x10] sm:$0xff]  ;;  %v85_v11 = vld [vmem:[#allocation5 + $0x18] sm:$0xff]  ;;  %s208_s8 = sshll.u32 %s405_s1, 4  ;;  %s209_s8 = int_to_ptr.vmem [resolvable:$true] %s208_s8 }
  0x29   :  { %v278_v10 = vpack.c.bf16 %v83_v8, %v82_v7  ;;  %v282_v12 = vpack.c.bf16 %v85_v11, %v84_v9  ;;  %v86_v21 = vld [vmem:[#allocation5 + $0x20] sm:$0xff]  ;;  %v87_v22 = vld [vmem:[#allocation5 + $0x28] sm:$0xff]  ;;  %v88_v24 = vld [vmem:[#allocation5 + $0x30] sm:$0xff]  ;;  %s371_s9 = scalar_lea.vmem %s209_s8, 64  ;;  %p376_p3 = scmp.lt.s32.totalorder %s209_s8, %s209_s8 }
  0x2a   :  { %v45_v3 = vshra.s32 %v448_v1, 16  ;;  %v59_v4 = vshra.s32 %v450_v2, 16  ;;  %v44_v13 = vand.u32 65535, %v448_v1  ;;  %v58_v15 = vand.u32 65535, %v450_v2  ;;  %v89_v25 = vld [vmem:[#allocation5 + $0x38] sm:$0xff]  ;;  %v90_v27 = vld [vmem:[#allocation5 + $0x40] sm:$0xff]  ;;  %p372_p2 = scmp.ne.s32.totalorder %s209_s8, %s371_s9  ;;  %p377_p4 = scmp.lt.s32.totalorder %s371_s9, %s371_s9 }
  0x2b   :  { %279 = vmatprep.subr.bf16.mxu0 %v278_v10  ;;  %v286_v23 = vpack.c.bf16 %v87_v22, %v86_v21  ;;  %v290_v26 = vpack.c.bf16 %v89_v25, %v88_v24  ;;  %v91_v28 = vld [vmem:[#allocation5 + $0x48] sm:$0xff]  ;;  %v92_v30 = vld [vmem:[#allocation5 + $0x50] sm:$0xff]  ;;  %v93_v31 = vld [vmem:[#allocation5 + $0x58] sm:$0xff] }
  0x2c   :  { %v47_v5 = vcvt.s32.f32 %v45_v3  ;;  %v61_v6 = vcvt.s32.f32 %v59_v4  ;;  %281 = vmatpush3.bf16.msra.mxu0 %v278_v10  ;;  %v46_v14 = vcvt.s32.f32 %v44_v13  ;;  %v60_v18 = vcvt.s32.f32 %v58_v15  ;;  %v94_v33 = vld [vmem:[#allocation5 + $0x60] sm:$0xff]  ;;  %v95_v34 = vld [vmem:[#allocation5 + $0x68] sm:$0xff]  ;;  %v96_v35 = vld [vmem:[#allocation5 + $0x70] sm:$0xff]  ;;  %p378_p5 = por %p377_p4, %p376_p3 }
  0x2d   :  { %283 = vmatprep.subr.bf16.mxu0 %v282_v12  ;;  %v294_v29 = vpack.c.bf16 %v91_v28, %v90_v27  ;;  %v298_v32 = vpack.c.bf16 %v93_v31, %v92_v30  ;;  %v302_v36 = vpack.c.bf16 %v95_v34, %v94_v33  ;;  %v97_v37 = vld [vmem:[#allocation5 + $0x78] sm:$0xff] }
  0x2e   :  { %48 = vmax.xlane.f32.xlu0 %v47_v5  ;;  %v306_v38 = vpack.c.bf16 %v97_v37, %v96_v35  ;;  %p379_p6 = pnand %p378_p5, %p372_p2 }
  0x30   :  { %285 = vmatpush3.bf16.msra.mxu0 %v282_v12 }
  0x31   :  { %287 = vmatprep.subr.bf16.mxu0 %v286_v23 }
  0x32   :  { %62 = vmax.xlane.f32.xlu0 %v61_v6 }
  0x34   :  { %289 = vmatpush3.bf16.msra.mxu0 %v286_v23 }
  0x35   :  { %291 = vmatprep.subr.bf16.mxu0 %v290_v26 }
  0x38   :  { %293 = vmatpush3.bf16.msra.mxu0 %v290_v26 }
  0x39   :  { %295 = vmatprep.subr.bf16.mxu0 %v294_v29 }
  0x3c   :  { %297 = vmatpush3.bf16.msra.mxu0 %v294_v29 }
  0x3d   :  { %299 = vmatprep.subr.bf16.mxu0 %v298_v32 }
  0x40   :  { %301 = vmatpush3.bf16.msra.mxu0 %v298_v32 }
  0x41   :  { %303 = vmatprep.subr.bf16.mxu0 %v302_v36 }
  0x44   :  { %305 = vmatpush3.bf16.msra.mxu0 %v302_v36 }
  0x45   :  { %307 = vmatprep.subr.bf16.mxu0 %v306_v38 }
  0x48   :  { %309 = vmatpush3.bf16.msra.mxu0 %v306_v38 }
  0xbb   :  { %v49_v16 = vpop.xlane.xlu0 %48 }
  0xbc   :  { %vm50_vm0 = vcmp.eq.f32.partialorder %v47_v5, %v49_v16  ;;  %v55_v39 = vcvt.f32.s32 %v49_v16 }
  0xbd   :  { %v51_v17 = vsel %vm50_vm0, %v46_v14, -inf }
  0xbe   :  { %52 = vmax.xlane.f32.xlu1 %v51_v17  ;;  %v56_v41 = vshll.u32 %v55_v39, 16 }
  0xbf   :  { %v63_v19 = vpop.xlane.xlu0 %62 }
  0xc0   :  { %vm64_vm1 = vcmp.eq.f32.partialorder %v61_v6, %v63_v19  ;;  %v69_v42 = vcvt.f32.s32 %v63_v19 }
  0xc1   :  { %v65_v20 = vsel %vm64_vm1, %v60_v18, -inf }
  0xc2   :  { %66 = vmax.xlane.f32.xlu1 %v65_v20  ;;  %v70_v46 = vshll.u32 %v69_v42, 16 }
 0x14b   :  { %v53_v40 = vpop.xlane.xlu1 %52 }
 0x14c   :  { %v54_v43 = vcvt.f32.s32 %v53_v40 }
 0x14e   :  { %v57_v44 = vadd.s32 %v56_v41, %v54_v43 }
 0x14f   :  { %v67_v45 = vpop.xlane.xlu1 %66 }
 0x150   :  { %v72_v47 = vsub.s32 %v448_v1, %v57_v44  ;;  %v68_v48 = vcvt.f32.s32 %v67_v45 }
 0x152   :  { %v74_v49 = vcvt.s32.f32 %v72_v47  ;;  %v71_v50 = vadd.s32 %v70_v46, %v68_v48 }
 0x154   :  { %v76_v51 = vmul.f32 0.05, %v74_v49  ;;  %v73_v52 = vsub.s32 %v450_v2, %v71_v50 }
 0x156   :  { %v78_v53 = vmul.f32 1.442695, %v76_v51  ;;  %v75_v54 = vcvt.s32.f32 %v73_v52 }
 0x158   :  { %319 = vpow2.f32 %v78_v53  ;;  %v77_v55 = vmul.f32 0.05, %v75_v54 }
 0x15a   :  { %v80_v56 = vmul.f32 1.442695, %v77_v55 }
 0x15c   :  { %321 = vpow2.f32 %v80_v56 }
 0x162   :  { %v320_v57 = vpop.eup %319 }
 0x163   :  { %275 = vmatprep.mubr.f32.mxu0 %v320_v57 }
 0x166   :  { %v322_v58 = vpop.eup %321 }
 0x167   :  { %276 = vmatmul.mubr.f32.vlgmr.msra.gmra.mrb[0].mxu0 %v322_v58 }
 0x23a   :  { %v277_v59 = vpop.f32.mrb[0].mxu0 }
 0x23b   :  { %323 = vrcp.f32 %v277_v59  ;;  %v164_v60 = vpop.f32.mrb[1].mxu0 }
 0x23c   :  { %325 = vrcp.f32 %v164_v60 }
 0x245   :  { %v324_v61 = vpop.eup %323 }
 0x246   :  { %v326_v62 = vpop.eup %325  ;;  %v176_v63 = vmul.f32 277.77777, %v324_v61 }
 0x247   :  { %v175_v0 = vmul.f32 277.77777, %v326_v62 }
 0x248   :  { %v178_v1 = vmul.f32 %v322_v58, %v176_v63 }
 0x249   :  { %v177_v2 = vmul.f32 %v320_v57, %v175_v0 }
 0x24a   :  { %v311_v3 = vround.rtne.f32 %v178_v1 }
 0x24b   :  { %v310_v4 = vround.rtne.f32 %v177_v2 }
 0x24c   :  { %v184_v5 = vmax.f32 %v311_v3, -128.0 }
 0x24d   :  { %v183_v6 = vmax.f32 %v310_v4, -128.0 }
 0x24e   :  { %v186_v7 = vmin.f32 %v184_v5, 127.0 }
 0x24f   :  { %v185_v8 = vmin.f32 %v183_v6, 127.0 }
 0x250   :  { %v188_v9 = vtrunc.f32 %v186_v7 }
 0x251   :  { %v187_v10 = vtrunc.f32 %v185_v8 }
 0x253   :  { %v189_v11 = vpack.c.f32.eXmY %v187_v10, %v188_v9, 312 }
 0x255   :  { %v193_v12 = vpack.c.b8 %v189_v11, %v189_v11 }
 0x257   :  { %v195_v13 = vunpack.c.0.s8 %v193_v12  ;;  %v196_v14 = vunpack.c.1.s8 %v193_v12 }
 0x259   :  { %v197_v15 = vpack.c.b16 %v195_v13, %v195_v13  ;;  %v199_v16 = vpack.c.b16 %v196_v14, %v196_v14 }
 0x25b   :  { %v198_v17 = vpack.c.b8 %v197_v15, %v197_v15  ;;  %v200_v18 = vpack.c.b8 %v199_v16, %v199_v16 }
 0x25d   :  { %201 = vst [vmem:[#allocation7] sm:$0x3] %v198_v17  ;;  %202 = vst [vmem:[#allocation7 + $0x2] sm:$0x3] %v200_v18 }
 0x25e   :  { %382 = shalt.err (!%p379_p6)
}
 0x25f   :  { %s383_s12 = scalar_lea.hbm %s475_s2, 64 }
 0x260   :  { %p384_p7 = scmp.ne.s32.totalorder %s475_s2, %s383_s12  ;;  %p387_p8 = scmp.lt.u32.totalorder %s383_s12, %s475_s2 }
 0x262   :  { %p389_p9 = pnand %p387_p8, %p384_p7 }
 0x264   :  { %392 = shalt.err (!%p389_p9)
}
 0x265   :  { %214 = dma.vmem_to_hbm [thread:$0]  %s209_s8, 64, %s475_s2, [#allocation4], %s400_s19, %s400_s19, %s401_s20  }
 0x266   :  { %397 = dma.done.wait [#allocation4], 64  }
 0x267   :  { %398 = vsyncadd [#allocation4], 4294967232 }
 0x268   :  { %218 = vsyncpa [#allocation3], 1 }
 0x269   :  { %219 = vsyncpa [#allocation6], 1 }
 0x26a   :  { %220 = vsyncpa [#allocation4], 1 }

</bundles_post_ra>
